<compile_context>
chip_gen: v6e
topology: v6e:2x2x1
jax: 0.10.0
libtpu: 0.0.40
codegen_flags: <defaults>
</compile_context>

<pallas_src>
import jax
import jax.numpy as jnp
from jax.experimental import pallas as pl
from jax.experimental.pallas import tpu as pltpu


def _concat_injection_kernel(x_ref, w_ref, fb_ref, o_ref):
    # x_ref  : (C_orig, TILE_HW)   activation tile (batch dim squeezed)
    # w_ref  : (C_out, C_orig)     resident 1x1-conv weight (x_orig part)
    # fb_ref : (C_out, 1)          per-batch fused bias = W_inj @ inj[b] + bias
    # o_ref  : (C_out, TILE_HW)
    o_ref[...] = (
        jnp.dot(w_ref[...], x_ref[...], preferred_element_type=jnp.float32)
        + fb_ref[...]
    ).astype(o_ref.dtype)


def _pick_tile_hw(hw, cap=2048):
    """Largest lane tile that is a multiple of 128 and divides HW (capped);
    fall back to the full extent if HW is not a multiple of 128 (always legal).
    cap=2048 keeps 2x(in tile + out tile) far below the scoped-VMEM default on
    every generation (including v7x's 64 MiB) for typical channel counts."""
    if hw % 128 != 0:
        return hw
    tile = min(hw, cap)
    tile -= tile % 128
    while hw % tile != 0:
        tile -= 128
    return tile


def concat_injection_forward(x_inj_dict, x_orig, inj_inputs, weight, bias):
    """x_orig: (B, C_orig, H, W) NCHW float32.
    x_inj_dict: dict key -> (B,) float32. Injection channels are stacked in
    dict-iteration order filtered by inj_inputs, exactly mirroring the PyTorch
    forward (`for key in x_inj.keys() if key in self.inj_inputs`).
    weight: (C_out, C_orig + inj_channels, 1, 1), bias: (C_out,)."""
    B, C_orig, H, W = x_orig.shape
    HW = H * W

    keys = [k for k in x_inj_dict.keys() if k in inj_inputs]
    inj = jnp.stack([x_inj_dict[k] for k in keys], axis=1).astype(jnp.float32)  # (B, n_inj)
    n_inj = inj.shape[1]
    C_out = weight.shape[0]
    assert weight.shape[1] == C_orig + n_inj

    # split conv weight: (C_out, C_in, 1, 1) -> (C_out, C_orig) / (C_out, n_inj)
    w2d = weight[:, :, 0, 0]
    w_orig = w2d[:, :C_orig]                                   # (C_out, C_orig)
    w_inj = w2d[:, C_orig:]                                    # (C_out, n_inj)

    # fold the spatially-constant injection contribution into the bias.
    fused_bias = (inj @ w_inj.T + bias[None, :]).astype(jnp.float32)
    fused_bias = fused_bias.reshape(B, C_out, 1)               # (B, C_out, 1)

    # NCHW-native flatten (free reshape).
    x_flat = x_orig.reshape(B, C_orig, HW)                     # (B, C_orig, HW)

    tile_hw = _pick_tile_hw(HW)
    grid = (B, HW // tile_hw)

    flops = 2 * B * HW * C_orig * C_out
    bytes_accessed = 4 * (x_flat.size + w_orig.size + fused_bias.size
                          + B * C_out * HW)

    out_flat = pl.pallas_call(
        _concat_injection_kernel,
        out_shape=jax.ShapeDtypeStruct((B, C_out, HW), jnp.float32),
        grid_spec=pltpu.PrefetchScalarGridSpec(
            num_scalar_prefetch=0,
            grid=grid,
            in_specs=[
                # None squeezes the size-1 batch dim -> kernel refs are 2-D.
                pl.BlockSpec((None, C_orig, tile_hw), lambda b, t: (b, 0, t)),
                pl.BlockSpec((C_out, C_orig), lambda b, t: (0, 0)),
                pl.BlockSpec((None, C_out, 1), lambda b, t: (b, 0, 0)),
            ],
            out_specs=pl.BlockSpec((None, C_out, tile_hw),
                                   lambda b, t: (b, 0, t)),
        ),
        compiler_params=pltpu.CompilerParams(
            dimension_semantics=("parallel", "parallel")),
        cost_estimate=pl.CostEstimate(
            flops=flops, transcendentals=0, bytes_accessed=bytes_accessed),
    )(x_flat, w_orig, fused_bias)

    # (B, C_out, HW) -> NCHW, free reshape.
    return out_flat.reshape(B, C_out, H, W)


def _reference_forward(x_inj_dict, x_orig, inj_inputs, weight, bias):
    """Plain-JAX replica of the PyTorch forward for validation."""
    B, C_orig, H, W = x_orig.shape
    keys = [k for k in x_inj_dict.keys() if k in inj_inputs]
    inj = jnp.stack([x_inj_dict[k] for k in keys], axis=1).astype(jnp.float32)
    inj_map = inj[:, :, None, None] * jnp.ones((1, 1, H, W), jnp.float32)
    x = jnp.concatenate([x_orig, inj_map], axis=1)             # (B, C_in, H, W)
    w2d = weight[:, :, 0, 0]                                   # (C_out, C_in)
    out = jnp.einsum("bchw,oc->bohw", x, w2d) + bias[None, :, None, None]
    return out


if __name__ == "__main__":
    # small shapes consistent with the module
    B, C_out, H, W = 2, 4, 16, 16
    inj_inputs = ("speed", "steer", "throttle")     # -> inj_channels = 3
    inj_channels = len(inj_inputs)

    key = jax.random.PRNGKey(0)
    k_x, k_w, k_b, k_i1, k_i2, k_i3, k_i4 = jax.random.split(key, 7)

    x_orig = jax.random.normal(k_x, (B, C_out, H, W), dtype=jnp.float32)
    # dict includes an extra key NOT in inj_inputs (filtered out, as in PyTorch)
    x_inj = {
        "speed": jax.random.normal(k_i1, (B,), dtype=jnp.float32),
        "steer": jax.random.normal(k_i2, (B,), dtype=jnp.float32),
        "brake": jax.random.normal(k_i3, (B,), dtype=jnp.float32),   # ignored
        "throttle": jax.random.normal(k_i4, (B,), dtype=jnp.float32),
    }

    # deterministic Conv2d parameters: weight (C_out, C_out+inj, 1, 1), bias (C_out,)
    C_in = C_out + inj_channels
    weight = 0.1 * jax.random.normal(k_w, (C_out, C_in, 1, 1), dtype=jnp.float32)
    bias = 0.1 * jax.random.normal(k_b, (C_out,), dtype=jnp.float32)

    out = concat_injection_forward(x_inj, x_orig, inj_inputs, weight, bias)
    out = jax.block_until_ready(out)

    ref = _reference_forward(x_inj, x_orig, inj_inputs, weight, bias)
    assert out.shape == (B, C_out, H, W)
    assert jnp.allclose(out, ref, atol=1e-5, rtol=1e-5), "mismatch vs reference"

    print("KERNEL_OK")
</pallas_src>

<mosaic_0001>
module attributes {stable_mosaic.version = 11 : i64} {
  func.func @_concat_injection_kernel(%arg0: i32, %arg1: i32, %arg2: memref<1x4x256xf32, #tpu.memory_space<vmem>>, %arg3: memref<4x4xf32, #tpu.memory_space<vmem>>, %arg4: memref<1x4x1xf32, #tpu.memory_space<vmem>>, %arg5: memref<1x4x256xf32, #tpu.memory_space<vmem>>) attributes {dimension_semantics = [#tpu.dimension_semantics<parallel>, #tpu.dimension_semantics<parallel>], iteration_bounds = array<i64: 2, 1>, scalar_prefetch = 0 : i64, scratch_operands = 0 : i64, tpu.core_type = #tpu.core_type<tc>, window_params = [{transform_indices = @transform_0, window_bounds = array<i64: 1, 4, 256>}, {pipeline_mode = #tpu.pipeline_mode<synchronous>, transform_indices = @transform_1, window_bounds = array<i64: 4, 4>}, {transform_indices = @transform_2, window_bounds = array<i64: 1, 4, 1>}, {transform_indices = @transform_3, window_bounds = array<i64: 1, 4, 256>}]} {
    %c0 = arith.constant 0 : index
    %c0_0 = arith.constant 0 : index
    %0 = vector.load %arg3[%c0, %c0_0] : memref<4x4xf32, #tpu.memory_space<vmem>>, vector<4x4xf32>
    %c0_1 = arith.constant 0 : index
    %c0_2 = arith.constant 0 : index
    %c0_3 = arith.constant 0 : index
    %1 = vector.load %arg2[%c0_1, %c0_2, %c0_3] : memref<1x4x256xf32, #tpu.memory_space<vmem>>, vector<1x4x256xf32>
    %2 = vector.shape_cast %1 : vector<1x4x256xf32> to vector<4x256xf32>
    %cst = arith.constant dense<0.000000e+00> : vector<4x256xf32>
    %3 = tpu.matmul %0, %2, %cst {dimension_numbers = #tpu.dot_dimension_numbers<[1], [0], [0], [1], [0, 0, 1, 1], [], []>} : vector<4x4xf32>, vector<4x256xf32>, vector<4x256xf32> -> vector<4x256xf32>
    %c0_4 = arith.constant 0 : index
    %c0_5 = arith.constant 0 : index
    %c0_6 = arith.constant 0 : index
    %4 = vector.load %arg4[%c0_4, %c0_5, %c0_6] : memref<1x4x1xf32, #tpu.memory_space<vmem>>, vector<1x4x1xf32>
    %5 = vector.shape_cast %4 : vector<1x4x1xf32> to vector<4x1xf32>
    %6 = vector.broadcast %5 : vector<4x1xf32> to vector<4x256xf32>
    %7 = arith.addf %3, %6 : vector<4x256xf32>
    %c0_7 = arith.constant 0 : index
    %c0_8 = arith.constant 0 : index
    %c0_9 = arith.constant 0 : index
    %8 = vector.load %arg5[%c0_7, %c0_8, %c0_9] : memref<1x4x256xf32, #tpu.memory_space<vmem>>, vector<1x4x256xf32>
    %9 = vector.shape_cast %8 : vector<1x4x256xf32> to vector<4x256xf32>
    %10 = vector.shape_cast %7 : vector<4x256xf32> to vector<1x4x256xf32>
    tpu.vector_store %arg5[%c0_7, %c0_8, %c0_9], %10 {strides = array<i32>} : memref<1x4x256xf32, #tpu.memory_space<vmem>>, vector<1x4x256xf32>,
    return
  }
  func.func @transform_0(%arg0: i32, %arg1: i32) -> (i32, i32, i32) {
    %c0_i32 = arith.constant 0 : i32
    %c0_i32_0 = arith.constant 0 : i32
    return %arg0, %c0_i32, %arg1 : i32, i32, i32
  }
  func.func @transform_1(%arg0: i32, %arg1: i32) -> (i32, i32) {
    %c0_i32 = arith.constant 0 : i32
    %c0_i32_0 = arith.constant 0 : i32
    %c0_i32_1 = arith.constant 0 : i32
    return %c0_i32, %c0_i32_0 : i32, i32
  }
  func.func @transform_2(%arg0: i32, %arg1: i32) -> (i32, i32, i32) {
    %c0_i32 = arith.constant 0 : i32
    %c0_i32_0 = arith.constant 0 : i32
    %c0_i32_1 = arith.constant 0 : i32
    return %arg0, %c0_i32, %c0_i32_0 : i32, i32, i32
  }
  func.func @transform_3(%arg0: i32, %arg1: i32) -> (i32, i32, i32) {
    %c0_i32 = arith.constant 0 : i32
    %c0_i32_0 = arith.constant 0 : i32
    return %arg0, %c0_i32, %arg1 : i32, i32, i32
  }
}

</mosaic_0001>

<bundles_post_ra>
// kernel: tpu_custom_call.1
= control target key start
LH: loop header
LB: loop body
LE: loop exit
PB: predicated region body
PF: predicated region fallthrough
CT: control target
= control target key end

     0   :  { %8 = vsyncpa [#allocation3], 0  ;;  %s795_s0 = inlined_call_operand.hbm [shape: f32[2,4,256], index: 0, kind: input, shape index: {}]   ;;  %s796_s1 = inlined_call_operand.vmem [shape: f32[4,4], index: 1, kind: input, shape index: {}]   ;;  %s797_s2 = inlined_call_operand.vmem [shape: f32[2,4,1], index: 2, kind: input, shape index: {}]   ;;  %s798_s3 = inlined_call_operand.hbm [shape: f32[2,4,256], index: 3, kind: output, shape index: {}]  }
   0x1   :  { %10 = vsyncpa [#allocation3 + $0x1], 0 }
   0x2   :  { %11 = vsyncpa [#allocation4], 0 }
   0x3   :  { %13 = vsyncpa [#allocation4 + $0x1], 0  ;;  %s653_s12 = smov 0   ;;  %s655_s13 = smov 0  }
   0x4   :  { %s657_s14 = smov 0   ;;  %s659_s15 = smov 0  }
   0x5   :  { %s661_s16 = smov 0   ;;  %s663_s17 = smov 0  }
   0x6 LB: > { %s432_s18 = sadd.s32 4294967295, %s627_s17   ;;  %s433_s19 = sadd.s32 4294967294, %s627_s17   ;;  %s627_s17 = sphi %s663_s17, %s19_s17   ;;  %s623_s16 = sphi %s661_s16, %s810_s16   ;;  %s619_s15 = sphi %s659_s15, %s809_s15   ;;  %s615_s14 = sphi %s657_s14, %s808_s14   ;;  %s611_s13 = sphi %s655_s13, %s807_s13   ;;  %s607_s12 = sphi %s653_s12, %s806_s12  }
   0x7   : > { %s31_s20 = sadd.s32 1, %s623_s16  ;;  %s40_s21 = sadd.s32 1, %s615_s14 }
   0x8   : > { %p33_p0 = scmp.ge.s32.totalorder %s31_s20, 2  ;;  %p47_p1 = scmp.ne.s32.totalorder %s615_s14, %s611_s13 }
   0x9   : > { %p48_p2 = scmp.eq.s32.totalorder %s627_s17, 0  ;;  %p53_p3 = scmp.ne.s32.totalorder %s611_s13, %s607_s12 }
   0xa   : > { %s812_s20 = smov (%p33_p0, %s31_s20), 0  ;;  %p54_p5 = scmp.eq.s32.totalorder %s432_s18, 0 }
   0xb   : > { %p694_p4 = por %p48_p2, %p47_p1  ;;  %s35_s23 = ssub.s32 %s623_s16, %s812_s20 }
   0xc   : > { %p126_p6 = scmp.eq.s32.totalorder %s432_s18, 1  ;;  %p38_p7 = scmp.eq.s32.totalorder %s35_s23, 0 }
   0xd   : > { %p700_p8 = por %p54_p5, %p53_p3  ;;  %p132_p10 = scmp.eq.s32.totalorder %s433_s19, 1 }
   0xe   : > { %p704_p9 = por %p126_p6, %p47_p1  ;;  %p465_p13 = scmp.lt.s32.totalorder %s627_s17, 2 }
   0xf   : > { %s709_s26 = scalar_select %p38_p7, %s615_s14, %s40_s21  }
  0x10   : > { %p711_p11 = por %p132_p10, %p53_p3  ;;  %s155_s28 = sand.u32 1, %s615_s14  }
  0x11   : > { %s436_s29 = sshll.u32 %s155_s28, 3  ;;  %s451_s30 = sshll.u32 %s623_s16, 7 }
  0x12   : > { %s802_s27 = scalar_select %p711_p11, 1, 0 }
  0x13   : > { %s167_s6 = scalar_lea.hbm %s795_s0, %s451_s30  ;;  %s159_s7 = scalar_lea.vmem [#allocation2], %s436_s29 }
  0x14   : > { %s169_s8 = sshll.u32 %s159_s7, 4  ;;  %p724_p0 = pnand %p465_p13, %p694_p4  ;;  %s170_s8 = int_to_ptr.vmem [resolvable:$true] %s169_s8 }
  0x15   : > { %p439_p1 = scmp.ge.s32.totalorder %s627_s17, 1  ;;  %p181_p2 = scmp.lt.s32.totalorder %s627_s17, 3 }
  0x16   : > { %s156_s10 = scalar_lea.sflag [#allocation3], %s155_s28  ;;  %p521_p3 = pneg %p724_p0 }
  0x17   : > { %s532_s11 = scalar_lea.vmem %s170_s8, 128  ;;  %s629_s18 = smov [#allocation2]  }
  0x18   : > { %p533_p5 = scmp.ne.s32.totalorder %s170_s8, %s532_s11  ;;  %s537_s19 = sshll.u32 %s629_s18, 4  ;;  %s538_s19 = int_to_ptr.vmem [resolvable:$false] %s537_s19 }
  0x19   : > { %s539_s21 = scalar_lea.vmem %s538_s19, 256  ;;  %p540_p10 = scmp.lt.s32.totalorder %s170_s8, %s538_s19 }
  0x1a   : > { %p535_p6 = pnand %p533_p5, %p521_p3  ;;  %p541_p12 = scmp.lt.s32.totalorder %s539_s21, %s532_s11 }
  0x1c   : > { %p536_p7 = pneg %p535_p6  ;;  %p542_p4 = por %p541_p12, %p540_p10 }
  0x1e   : > { %p543_p13 = pnand %p542_p4, %p536_p7 }
  0x20   : > { %546 = shalt.err (!%p543_p13)
}
  0x21   : > { %460 = dma.hbm_to_vmem [thread:$0]  (!%p724_p0), %s167_s6, 128, %s170_s8, %s156_s10  }
  0x22   : > { %p182_p11 = pnand %p439_p1, %p181_p2 }
  0x23   : > { %s739_s22 = sand.u32 (!%p182_p11), 1, %s611_s13  }
  0x24   : > { %185 = sbr.rel (%p182_p11) target bundleno = 259 (0x103), region = 32  ;;  %s440_s23 = sshll.u32 (!%p182_p11), %s739_s22, 3 }
  0x25   : > { %s188_s28 = scalar_lea.sflag (!%p182_p11), [#allocation3], %s739_s22  ;;  %s191_s29 = scalar_lea.vmem (!%p182_p11), [#allocation2], %s440_s23 }
  0x29   : > { %598 = dma.done.wait (%p700_p8), %s188_s28, 128  }
  0x2a   : > { %600 = vsyncadd (%p700_p8), %s188_s28, 4294967168  ;;  %p219_p12 = scmp.lt.s32.totalorder %s619_s15, 1  ;;  %v630_v0 = vmov 0.0   ;;  %v631_v1 = vmov 0   ;;  %v225_v2 = vld [vmem:[%s191_s29] sm:$0xff]  ;;  %vm238_vm0 = vcmask 1043456  }
  0x2b   : > { %307 = vmatprep.mubr.f32.mxu0 %v630_v0  ;;  %517 = vset.pattern.permute.xlu0 %v631_v1  ;;  %v233_v4 = vcombine.high %v225_v2, %v225_v2  ;;  %v224_v5 = vld [vmem:[%s796_s1] sm:$0xf]  ;;  %vm234_vm1 = vcmask 31744   ;;  %s452_s9 = sshll.u32 %s619_s15, 7  ;;  %s217_s10 = scalar_lea.vmem [#allocation5], %s440_s23 }
  0x2c   : > { %s220_s30 = scalar_select %p219_p12, %s619_s15, 1 }
  0x2d   : > { %443 = vmatprep.subr.msk.mxu0 %vm238_vm0, %v233_v4  ;;  %s336_s11 = sshll.u32 %s217_s10, 4  ;;  %s334_s21 = scalar_lea.hbm %s798_s3, %s452_s9  ;;  %s337_s11 = int_to_ptr.vmem [resolvable:$true] %s336_s11 }
  0x2e   : > { %s442_s4 = sshll.u32 %s220_s30, 2  ;;  %444 = vmatpush1.msk.msra.mxu0 %vm238_vm0, %v225_v2  ;;  %s320_s28 = scalar_lea.sflag [#allocation4], %s739_s22 }
  0x2f   : > { %s222_s7 = scalar_lea.vmem %s797_s2, %s442_s4  ;;  %445 = vmatmul.mubr.msk.f32.vlgmr.msra.gmra.mxu0 %vm234_vm1, %v224_v5  ;;  %s547_s29 = scalar_lea.vmem %s337_s11, 128 }
  0x30   : > { %v226_v3 = vld [vmem:[%s222_s7] sm:$0xf]  ;;  %p548_p8 = scmp.ne.s32.totalorder %s337_s11, %s547_s29  ;;  %s632_s30 = smov [#allocation5]  }
  0x31   : > { %229 = vperm.xlu0 %517, %v226_v3   ;;  %s551_s4 = sshll.u32 %s632_s30, 4  ;;  %s552_s4 = int_to_ptr.vmem [resolvable:$false] %s551_s4 }
  0x32   : > { %p549_p11 = pnand %p548_p8, %p704_p9  ;;  %s553_s15 = scalar_lea.vmem %s552_s4, 256 }
  0x33   : > { %p554_p1 = scmp.lt.s32.totalorder %s337_s11, %s552_s4  ;;  %p555_p2 = scmp.lt.s32.totalorder %s553_s15, %s547_s29 }
  0x34   : > { %p550_p0 = pneg %p549_p11 }
  0x35   : > { %p556_p3 = por %p555_p2, %p554_p1 }
  0x37   : > { %p557_p5 = pnand %p556_p3, %p550_p0 }
  0xac   : > { %v230_v6 = vpop.permute.xlu0 %229 }
  0xef   : > { %v309_v7 = vpop.f32.mrf.mxu0 }
  0xf0   : > { %v310_v9 = vadd.f32 %v309_v7, %v230_v6 }
  0xf1   : > { %v311_v8 = vpop.f32.mrf.mxu0 }
  0xf2   : > { %v312_v10 = vadd.f32 %v311_v8, %v230_v6 }
  0xf4   : > { %v316_v11 = vcombine.low %v310_v9, %v312_v10 }
  0xf6   : > { %318 = vst [vmem:[%s217_s10] sm:$0xff] %v316_v11 }
  0xf7   : > { %560 = shalt.err (!%p557_p5)
}
  0xf8   : > { %s561_s23 = scalar_lea.hbm %s334_s21, 128  ;;  %s565_s6 = scalar_lea.hbm %s798_s3, 256 }
  0xf9   : > { %p562_p6 = scmp.ne.s32.totalorder %s334_s21, %s561_s23  ;;  %p566_p4 = scmp.lt.s32.totalorder %s334_s21, %s798_s3 }
  0xfa   : > { %p567_p13 = scmp.lt.s32.totalorder %s565_s6, %s561_s23 }
  0xfb   : > { %p563_p7 = pnand %p562_p6, %p704_p9 }
  0xfc   : > { %p568_p12 = por %p567_p13, %p566_p4 }
  0xfd   : > { %p564_p10 = pneg %p563_p7 }
  0xff   : > { %p569_p8 = pnand %p568_p12, %p564_p10 }
 0x101   : > { %572 = shalt.err (!%p569_p8)
}
 0x102   : > { %455 = dma.vmem_to_hbm [thread:$0]  (%p704_p9), %s337_s11, 128, %s334_s21, %s320_s28  }
 0x103 PF: > { %s348_s8 = sand.u32 1, %s607_s12   ;;  %p804_p11 = scmp.ne.s32.totalorder %s802_s27, 0 }
 0x104   : > { %p805_p0 = scmp.ge.s32.totalorder %s627_s17, 2  ;;  %s349_s9 = scalar_lea.sflag [#allocation4], %s348_s8 }
 0x106   : > { %p462_p1 = pnand %p805_p0, %p804_p11 }
 0x108   : > { %p463_p2 = pneg %p462_p1 }
 0x10a   : > { %602 = dma.done.wait (%p463_p2), %s349_s9, 128  }
 0x10b   : > { %604 = vsyncadd (%p463_p2), %s349_s9, 4294967168  ;;  %s19_s17 = sadd.s32 1, %s627_s17   ;;  %s806_s12 = smov %s611_s13 }
 0x10c   : > { %p16_p3 = scmp.ge.s32.totalorder %s19_s17, 4   ;;  %s807_s13 = smov %s615_s14 }
 0x10d   : > { %s808_s14 = smov %s709_s26  ;;  %s809_s15 = smov %s623_s16 }
 0x10e   : > { %s810_s16 = smov %s812_s20  ;;  %18 = sbr.rel (!%p16_p3) target bundleno = 6 (0x6), region = 80 }
 0x113   :  { %354 = vsyncpa [#allocation3], 1 }
 0x114   :  { %356 = vsyncpa [#allocation3 + $0x1], 1 }
 0x115   :  { %357 = vsyncpa [#allocation4], 1 }
 0x116   :  { %359 = vsyncpa [#allocation4 + $0x1], 1 }

</bundles_post_ra>
